<compile_context>
chip_gen: v5e
topology: v5e:2x2
jax: 0.10.0
libtpu: 0.0.40
codegen_flags: <defaults>
</compile_context>

<pallas_src>
import functools

import jax
import jax.numpy as jnp
from jax.experimental import pallas as pl
from jax.experimental.pallas import tpu as pltpu

BN_EPS = 1e-5


def _round_up(n, m):
    return ((n + m - 1) // m) * m


def _vmem_budget_bytes():
    """~75% of physical VMEM; conservative 48 MiB fallback (v7x has 64 MiB/TC)."""
    try:
        cap = int(pltpu.get_tpu_info().vmem_capacity_bytes)
    except Exception:
        cap = 64 * 1024 * 1024
    return int(cap * 3 // 4)


# ----------------------------------------------------------------------------
# One-time parameter preparation (outside the hot path): transpose to (in, out),
# zero-pad feature dims to multiples of 128, cast matmul operands to compute_dtype.
# b1 is dropped: with training-mode BatchNorm it cancels exactly in (h - mean(h)).
# ----------------------------------------------------------------------------
def prepare_params(w1, b1, gamma, beta, w2, b2, compute_dtype=jnp.bfloat16):
    H, In = w1.shape
    Out = w2.shape[0]
    Hp = _round_up(H, 128)
    Op = _round_up(Out, 128)
    del b1  # exact no-op under batch-statistics BatchNorm

    w1p = jnp.zeros((In, Hp), compute_dtype).at[:, :H].set(w1.T.astype(compute_dtype))
    w2p = jnp.zeros((Hp, Op), compute_dtype).at[:H, :Out].set(w2.T.astype(compute_dtype))
    gammap = jnp.zeros((1, Hp), jnp.float32).at[:, :H].set(gamma.astype(jnp.float32))
    betap = jnp.zeros((1, Hp), jnp.float32).at[:, :H].set(beta.astype(jnp.float32))
    # Padded logit lanes get -1e9 so they vanish under softmax.
    b2p = jnp.full((1, Op), -1e9, jnp.float32).at[:, :Out].set(b2.astype(jnp.float32))

    return dict(w1=w1p, gamma=gammap, beta=betap, w2=w2p, b2=b2p,
                in_features=In, hidden=H, out_features=Out,
                h_pad=Hp, out_pad=Op, compute_dtype=compute_dtype)


# ----------------------------------------------------------------------------
# Fused kernel: grid = (2 phases, nbt batch tiles), h kept in a VMEM scratch.
#   phase 0: h = x @ W1, store to scratch, accumulate per-feature sum / sum-of-squares.
#   phase 1 (tile 0): fold BN stats once into scale/shift scratch.
#   phase 1: BN + ReLU + Linear-2 + Softmax, write lane-dense (TB, Op) output.
# ----------------------------------------------------------------------------
def _fused_kernel(x_ref, w1_ref, gamma_ref, beta_ref, w2_ref, b2_ref, o_ref,
                  h_scr, sum_scr, ssq_scr, scale_scr, shift_scr, *, inv_batch):
    phase = pl.program_id(0)
    j = pl.program_id(1)

    @pl.when(phase == 0)
    def _fc1_and_stats():
        @pl.when(j == 0)
        def _init():
            sum_scr[...] = jnp.zeros_like(sum_scr)
            ssq_scr[...] = jnp.zeros_like(ssq_scr)

        h = jnp.dot(x_ref[...], w1_ref[...], preferred_element_type=jnp.float32)
        h_scr[j] = h.astype(h_scr.dtype)
        sum_scr[...] += jnp.sum(h, axis=0, keepdims=True)
        ssq_scr[...] += jnp.sum(h * h, axis=0, keepdims=True)

    @pl.when(phase == 1)
    def _bn_fc2_softmax():
        @pl.when(j == 0)
        def _fold_bn():
            mean = sum_scr[...] * inv_batch
            # TODO(synk): one-pass E[h^2]-mean^2 can lose precision for large-mean
            # activations; move to a shifted/two-pass scheme if BN stats must be robust.
            var = jnp.maximum(ssq_scr[...] * inv_batch - mean * mean, 0.0)
            s = jax.lax.rsqrt(var + BN_EPS) * gamma_ref[...]
            scale_scr[...] = s
            shift_scr[...] = beta_ref[...] - mean * s

        h = h_scr[j].astype(jnp.float32)
        a = jnp.maximum(h * scale_scr[...] + shift_scr[...], 0.0)        # BN + ReLU
        logits = jnp.dot(a.astype(w2_ref.dtype), w2_ref[...],
                         preferred_element_type=jnp.float32) + b2_ref[...]
        m = jnp.max(logits, axis=-1, keepdims=True)
        e = jnp.exp(logits - m)
        denom = jnp.sum(e, axis=-1, keepdims=True)
        o_ref[...] = e * pl.reciprocal(denom, approx=True)


def _forward_fused(xc, params, B_true, B_pad, TB, nbt, vmem_budget):
    In, Hp, Op = params["in_features"], params["h_pad"], params["out_pad"]
    cdt = params["compute_dtype"]
    kern = functools.partial(_fused_kernel, inv_batch=1.0 / B_true)
    return pl.pallas_call(
        kern,
        out_shape=jax.ShapeDtypeStruct((B_pad, Op), jnp.float32),
        grid=(2, nbt),
        in_specs=[
            pl.BlockSpec((TB, In), lambda p, j: ((1 - p) * j, 0)),  # x only read in phase 0
            pl.BlockSpec((In, Hp), lambda p, j: (0, 0)),            # W1 VMEM-resident
            pl.BlockSpec((1, Hp), lambda p, j: (0, 0)),             # gamma
            pl.BlockSpec((1, Hp), lambda p, j: (0, 0)),             # beta
            pl.BlockSpec((Hp, Op), lambda p, j: (0, 0)),            # W2 VMEM-resident
            pl.BlockSpec((1, Op), lambda p, j: (0, 0)),             # b2 (+ -1e9 pad lanes)
        ],
        out_specs=pl.BlockSpec((TB, Op), lambda p, j: (p * j, 0)),  # written only in phase 1
        scratch_shapes=[
            pltpu.VMEM((nbt, TB, Hp), cdt),      # resident hidden activation (never hits HBM)
            pltpu.VMEM((1, Hp), jnp.float32),    # sum(h)
            pltpu.VMEM((1, Hp), jnp.float32),    # sum(h^2)
            pltpu.VMEM((1, Hp), jnp.float32),    # folded BN scale (hoisted, computed once)
            pltpu.VMEM((1, Hp), jnp.float32),    # folded BN shift
        ],
        compiler_params=pltpu.CompilerParams(
            dimension_semantics=("arbitrary", "arbitrary"),
            vmem_limit_bytes=vmem_budget),
    )(xc, params["w1"], params["gamma"], params["beta"], params["w2"], params["b2"])


# ----------------------------------------------------------------------------
# Streaming fallback: h is never materialized in HBM.
#   Pass A: per-tile partial sum / sum-of-squares, "parallel" grid axis (v7x megacore).
#   Pass B: recompute h = x@W1, BN (prefolded scale/shift), ReLU, fc2, softmax.
# ----------------------------------------------------------------------------
def _stats_partial_kernel(x_ref, w1_ref, stats_ref):
    h = jnp.dot(x_ref[...], w1_ref[...], preferred_element_type=jnp.float32)
    s = jnp.sum(h, axis=0, keepdims=True)        # (1, Hp)
    ss = jnp.sum(h * h, axis=0, keepdims=True)   # (1, Hp)
    rows = jax.lax.broadcasted_iota(jnp.int32, stats_ref.shape, 0)  # (8, Hp)
    stats_ref[...] = jnp.where(rows == 0, s, jnp.where(rows == 1, ss, 0.0))


def _fwd_recompute_kernel(x_ref, w1_ref, scale_ref, shift_ref, w2_ref, b2_ref, o_ref):
    h = jnp.dot(x_ref[...], w1_ref[...], preferred_element_type=jnp.float32)
    a = jnp.maximum(h * scale_ref[...] + shift_ref[...], 0.0)
    logits = jnp.dot(a.astype(w2_ref.dtype), w2_ref[...],
                     preferred_element_type=jnp.float32) + b2_ref[...]
    m = jnp.max(logits, axis=-1, keepdims=True)
    e = jnp.exp(logits - m)
    denom = jnp.sum(e, axis=-1, keepdims=True)
    o_ref[...] = e * pl.reciprocal(denom, approx=True)


def _forward_streaming(xc, params, B_true, B_pad, TB, nbt, vmem_budget):
    In, Hp, Op = params["in_features"], params["h_pad"], params["out_pad"]

    stats = pl.pallas_call(
        _stats_partial_kernel,
        out_shape=jax.ShapeDtypeStruct((8 * nbt, Hp), jnp.float32),
        grid=(nbt,),
        in_specs=[
            pl.BlockSpec((TB, In), lambda j: (j, 0)),
            pl.BlockSpec((In, Hp), lambda j: (0, 0)),
        ],
        out_specs=pl.BlockSpec((8, Hp), lambda j: (j, 0)),
        compiler_params=pltpu.CompilerParams(
            dimension_semantics=("parallel",),
            vmem_limit_bytes=vmem_budget),
    )(xc, params["w1"])

    # Tiny (nbt, Hp) reduction + BN fold done once in XLA (hoisted out of the tile loop).
    stats = stats.reshape(nbt, 8, Hp)
    hsum = jnp.sum(stats[:, 0, :], axis=0, keepdims=True)
    hssq = jnp.sum(stats[:, 1, :], axis=0, keepdims=True)
    mean = hsum / B_true
    var = jnp.maximum(hssq / B_true - mean * mean, 0.0)
    scale = params["gamma"] * jax.lax.rsqrt(var + BN_EPS)
    shift = params["beta"] - mean * scale

    return pl.pallas_call(
        _fwd_recompute_kernel,
        out_shape=jax.ShapeDtypeStruct((B_pad, Op), jnp.float32),
        grid=(nbt,),
        in_specs=[
            pl.BlockSpec((TB, In), lambda j: (j, 0)),
            pl.BlockSpec((In, Hp), lambda j: (0, 0)),
            pl.BlockSpec((1, Hp), lambda j: (0, 0)),
            pl.BlockSpec((1, Hp), lambda j: (0, 0)),
            pl.BlockSpec((Hp, Op), lambda j: (0, 0)),
            pl.BlockSpec((1, Op), lambda j: (0, 0)),
        ],
        out_specs=pl.BlockSpec((TB, Op), lambda j: (j, 0)),
        compiler_params=pltpu.CompilerParams(
            dimension_semantics=("parallel",),
            vmem_limit_bytes=vmem_budget),
    )(xc, params["w1"], scale, shift, params["w2"], params["b2"])


# ----------------------------------------------------------------------------
# Wrapper
# ----------------------------------------------------------------------------
def two_layer_net(x, params, *, tb=None, force_streaming=False):
    """x: (B, In) float array. params: output of prepare_params."""
    B, In = x.shape
    assert In == params["in_features"]
    Hp, Op, Out = params["h_pad"], params["out_pad"], params["out_features"]
    cdt = params["compute_dtype"]
    cdt_size = jnp.dtype(cdt).itemsize

    # Batch tiling: big tiles (mem-bound roofline), ragged batches zero-row padded.
    # Zero rows contribute exactly 0 to sum/ssq (Linear-1 has no bias here), and their
    # softmax rows are sliced off below -> statistics stay exact with inv_batch = 1/B.
    TB = min(512, _round_up(B, 8)) if tb is None else _round_up(tb, 8)
    B_pad = _round_up(B, TB)
    nbt = B_pad // TB

    xc = x.astype(cdt)
    if B_pad != B:
        xc = jnp.zeros((B_pad, In), cdt).at[:B].set(xc)

    budget = _vmem_budget_bytes()

    # Fused-path VMEM estimate: resident h scratch + weights + double-buffered I/O tiles.
    fused_bytes = (B_pad * Hp * cdt_size
                   + In * Hp * cdt_size + Hp * Op * cdt_size
                   + 2 * TB * In * cdt_size + 2 * TB * Op * 4
                   + 8 * Hp * 4 + Op * 4)
    use_fused = (not force_streaming) and fused_bytes < budget

    if use_fused:
        out_padded = _forward_fused(xc, params, B, B_pad, TB, nbt, budget)
    else:
        out_padded = _forward_streaming(xc, params, B, B_pad, TB, nbt, budget)

    # TODO(synk): for production consumers, return the padded (B_pad, Op) buffer directly
    # so the slice can fuse into the consumer; here we slice for shape parity with PyTorch.
    return out_padded[:B, :Out]


# ----------------------------------------------------------------------------
# Pure-JAX reference with the exact PyTorch forward semantics (incl. b1).
# ----------------------------------------------------------------------------
def reference(x, w1, b1, gamma, beta, w2, b2):
    h = x @ w1.T + b1
    mean = h.mean(axis=0, keepdims=True)
    var = ((h - mean) ** 2).mean(axis=0, keepdims=True)
    h = (h - mean) / jnp.sqrt(var + BN_EPS) * gamma + beta
    a = jnp.maximum(h, 0.0)
    logits = a @ w2.T + b2
    return jax.nn.softmax(logits, axis=1)


if __name__ == "__main__":
    batch, input_size, hidden_size, output_size = 8, 64, 32, 16

    key = jax.random.PRNGKey(0)
    kx, kw1, kb1, kw2, kb2, kg, kbt, kx2 = jax.random.split(key, 8)

    x = jax.random.normal(kx, (batch, input_size), dtype=jnp.float32)

    lim1 = 1.0 / jnp.sqrt(input_size)
    w1 = jax.random.uniform(kw1, (hidden_size, input_size), jnp.float32, -lim1, lim1)
    b1 = jax.random.uniform(kb1, (hidden_size,), jnp.float32, -lim1, lim1)
    lim2 = 1.0 / jnp.sqrt(hidden_size)
    w2 = jax.random.uniform(kw2, (output_size, hidden_size), jnp.float32, -lim2, lim2)
    b2 = jax.random.uniform(kb2, (output_size,), jnp.float32, -lim2, lim2)
    gamma = 1.0 + 0.1 * jax.random.normal(kg, (hidden_size,), jnp.float32)
    beta = 0.1 * jax.random.normal(kbt, (hidden_size,), jnp.float32)

    ref = reference(x, w1, b1, gamma, beta, w2, b2)

    # 1) f32 compute, fused (single pallas_call, h VMEM-resident) path.
    params_f32 = prepare_params(w1, b1, gamma, beta, w2, b2, compute_dtype=jnp.float32)
    out_f32 = jax.block_until_ready(two_layer_net(x, params_f32))
    assert out_f32.shape == (batch, output_size)
    assert jnp.allclose(out_f32, ref, atol=2e-3, rtol=2e-3), "f32 fused path mismatch"

    # 2) bf16-MXU / f32-accumulate fused path.
    params_bf16 = prepare_params(w1, b1, gamma, beta, w2, b2, compute_dtype=jnp.bfloat16)
    out_bf16 = jax.block_until_ready(two_layer_net(x, params_bf16))
    assert out_bf16.shape == (batch, output_size)
    assert jnp.allclose(out_bf16, ref, atol=2e-2, rtol=2e-2), "bf16 fused path mismatch"
    assert jnp.allclose(out_bf16.sum(axis=1), 1.0, atol=1e-2), "softmax rows must sum to 1"

    # 3) Streaming / recompute fallback on a ragged batch (exercises zero-row padding,
    #    per-tile partial stats with a "parallel" grid axis, and wrapper-side BN fold).
    batch2 = 20
    x2 = jax.random.normal(kx2, (batch2, input_size), dtype=jnp.float32)
    ref2 = reference(x2, w1, b1, gamma, beta, w2, b2)
    out2 = jax.block_until_ready(
        two_layer_net(x2, params_f32, tb=8, force_streaming=True))
    assert out2.shape == (batch2, output_size)
    assert jnp.allclose(out2, ref2, atol=2e-3, rtol=2e-3), "streaming path mismatch"

    print("KERNEL_OK")
</pallas_src>

<mosaic_0001>
module attributes {stable_mosaic.version = 11 : i64} {
  func.func @_fused_kernel(%arg0: i32, %arg1: i32, %arg2: memref<8x64xf32, #tpu.memory_space<vmem>>, %arg3: memref<64x128xf32, #tpu.memory_space<vmem>>, %arg4: memref<1x128xf32, #tpu.memory_space<vmem>>, %arg5: memref<1x128xf32, #tpu.memory_space<vmem>>, %arg6: memref<128x128xf32, #tpu.memory_space<vmem>>, %arg7: memref<1x128xf32, #tpu.memory_space<vmem>>, %arg8: memref<8x128xf32, #tpu.memory_space<vmem>>, %arg9: memref<1x8x128xf32, #tpu.memory_space<vmem>>, %arg10: memref<1x128xf32, #tpu.memory_space<vmem>>, %arg11: memref<1x128xf32, #tpu.memory_space<vmem>>, %arg12: memref<1x128xf32, #tpu.memory_space<vmem>>, %arg13: memref<1x128xf32, #tpu.memory_space<vmem>>) attributes {dimension_semantics = [#tpu.dimension_semantics<arbitrary>, #tpu.dimension_semantics<arbitrary>], iteration_bounds = array<i64: 2, 1>, scalar_prefetch = 0 : i64, scratch_operands = 5 : i64, tpu.core_type = #tpu.core_type<tc>, window_params = [{transform_indices = @transform_0, window_bounds = array<i64: 8, 64>}, {pipeline_mode = #tpu.pipeline_mode<synchronous>, transform_indices = @transform_1, window_bounds = array<i64: 64, 128>}, {pipeline_mode = #tpu.pipeline_mode<synchronous>, transform_indices = @transform_2, window_bounds = array<i64: 1, 128>}, {pipeline_mode = #tpu.pipeline_mode<synchronous>, transform_indices = @transform_3, window_bounds = array<i64: 1, 128>}, {pipeline_mode = #tpu.pipeline_mode<synchronous>, transform_indices = @transform_4, window_bounds = array<i64: 128, 128>}, {pipeline_mode = #tpu.pipeline_mode<synchronous>, transform_indices = @transform_5, window_bounds = array<i64: 1, 128>}, {transform_indices = @transform_6, window_bounds = array<i64: 8, 128>}]} {
    %c0_i32 = arith.constant 0 : i32
    %0 = arith.cmpi eq, %arg0, %c0_i32 : i32
    %1 = arith.extui %0 : i1 to i32
    %c0_i32_0 = arith.constant 0 : i32
    %2 = arith.cmpi ne, %1, %c0_i32_0 : i32
    scf.if %2 {
      %c0_i32_2 = arith.constant 0 : i32
      %6 = arith.cmpi eq, %arg1, %c0_i32_2 : i32
      %7 = arith.extui %6 : i1 to i32
      %c0_i32_3 = arith.constant 0 : i32
      %8 = arith.cmpi ne, %7, %c0_i32_3 : i32
      scf.if %8 {
        %cst_19 = arith.constant 0.000000e+00 : f32
        %27 = vector.broadcast %cst_19 : f32 to vector<1x128xf32>
        %c0_20 = arith.constant 0 : index
        %c0_21 = arith.constant 0 : index
        %28 = vector.load %arg10[%c0_20, %c0_21] : memref<1x128xf32, #tpu.memory_space<vmem>>, vector<1x128xf32>
        tpu.vector_store %arg10[%c0_20, %c0_21], %27 {strides = array<i32>} : memref<1x128xf32, #tpu.memory_space<vmem>>, vector<1x128xf32>,
        %cst_22 = arith.constant 0.000000e+00 : f32
        %29 = vector.broadcast %cst_22 : f32 to vector<1x128xf32>
        %c0_23 = arith.constant 0 : index
        %c0_24 = arith.constant 0 : index
        %30 = vector.load %arg11[%c0_23, %c0_24] : memref<1x128xf32, #tpu.memory_space<vmem>>, vector<1x128xf32>
        tpu.vector_store %arg11[%c0_23, %c0_24], %29 {strides = array<i32>} : memref<1x128xf32, #tpu.memory_space<vmem>>, vector<1x128xf32>,
      } else {
      }
      %c0 = arith.constant 0 : index
      %c0_4 = arith.constant 0 : index
      %9 = vector.load %arg2[%c0, %c0_4] : memref<8x64xf32, #tpu.memory_space<vmem>>, vector<8x64xf32>
      %c0_5 = arith.constant 0 : index
      %c0_6 = arith.constant 0 : index
      %10 = vector.load %arg3[%c0_5, %c0_6] : memref<64x128xf32, #tpu.memory_space<vmem>>, vector<64x128xf32>
      %cst = arith.constant dense<0.000000e+00> : vector<8x128xf32>
      %11 = tpu.matmul %9, %10, %cst {dimension_numbers = #tpu.dot_dimension_numbers<[1], [0], [0], [1], [0, 0, 1, 1], [], []>} : vector<8x64xf32>, vector<64x128xf32>, vector<8x128xf32> -> vector<8x128xf32>
      %12 = arith.index_cast %arg1 : i32 to index
      %c0_7 = arith.constant 0 : index
      %c0_8 = arith.constant 0 : index
      %13 = vector.load %arg9[%12, %c0_7, %c0_8] : memref<1x8x128xf32, #tpu.memory_space<vmem>>, vector<1x8x128xf32>
      %14 = vector.shape_cast %13 : vector<1x8x128xf32> to vector<8x128xf32>
      %15 = vector.shape_cast %11 : vector<8x128xf32> to vector<1x8x128xf32>
      tpu.vector_store %arg9[%12, %c0_7, %c0_8], %15 {strides = array<i32>} : memref<1x8x128xf32, #tpu.memory_space<vmem>>, vector<1x8x128xf32>,
      %c0_9 = arith.constant 0 : index
      %c0_10 = arith.constant 0 : index
      %16 = vector.load %arg10[%c0_9, %c0_10] : memref<1x128xf32, #tpu.memory_space<vmem>>, vector<1x128xf32>
      %cst_11 = arith.constant dense<0.000000e+00> : vector<128xf32>
      %17 = vector.multi_reduction <add>, %11, %cst_11 [0] : vector<8x128xf32> to vector<128xf32>
      %18 = vector.shape_cast %17 : vector<128xf32> to vector<1x128xf32>
      %19 = arith.addf %16, %18 : vector<1x128xf32>
      %c0_12 = arith.constant 0 : index
      %c0_13 = arith.constant 0 : index
      %20 = vector.load %arg10[%c0_12, %c0_13] : memref<1x128xf32, #tpu.memory_space<vmem>>, vector<1x128xf32>
      tpu.vector_store %arg10[%c0_12, %c0_13], %19 {strides = array<i32>} : memref<1x128xf32, #tpu.memory_space<vmem>>, vector<1x128xf32>,
      %c0_14 = arith.constant 0 : index
      %c0_15 = arith.constant 0 : index
      %21 = vector.load %arg11[%c0_14, %c0_15] : memref<1x128xf32, #tpu.memory_space<vmem>>, vector<1x128xf32>
      %22 = arith.mulf %11, %11 : vector<8x128xf32>
      %cst_16 = arith.constant dense<0.000000e+00> : vector<128xf32>
      %23 = vector.multi_reduction <add>, %22, %cst_16 [0] : vector<8x128xf32> to vector<128xf32>
      %24 = vector.shape_cast %23 : vector<128xf32> to vector<1x128xf32>
      %25 = arith.addf %21, %24 : vector<1x128xf32>
      %c0_17 = arith.constant 0 : index
      %c0_18 = arith.constant 0 : index
      %26 = vector.load %arg11[%c0_17, %c0_18] : memref<1x128xf32, #tpu.memory_space<vmem>>, vector<1x128xf32>
      tpu.vector_store %arg11[%c0_17, %c0_18], %25 {strides = array<i32>} : memref<1x128xf32, #tpu.memory_space<vmem>>, vector<1x128xf32>,
    } else {
    }
    %c1_i32 = arith.constant 1 : i32
    %3 = arith.cmpi eq, %arg0, %c1_i32 : i32
    %4 = arith.extui %3 : i1 to i32
    %c0_i32_1 = arith.constant 0 : i32
    %5 = arith.cmpi ne, %4, %c0_i32_1 : i32
    scf.if %5 {
      %c0_i32_2 = arith.constant 0 : i32
      %6 = arith.cmpi eq, %arg1, %c0_i32_2 : i32
      %7 = arith.extui %6 : i1 to i32
      %c0_i32_3 = arith.constant 0 : i32
      %8 = arith.cmpi ne, %7, %c0_i32_3 : i32
      scf.if %8 {
        %c0_18 = arith.constant 0 : index
        %c0_19 = arith.constant 0 : index
        %36 = vector.load %arg10[%c0_18, %c0_19] : memref<1x128xf32, #tpu.memory_space<vmem>>, vector<1x128xf32>
        %cst_20 = arith.constant 1.250000e-01 : f32
        %37 = vector.broadcast %cst_20 : f32 to vector<1x128xf32>
        %38 = arith.mulf %36, %37 : vector<1x128xf32>
        %c0_21 = arith.constant 0 : index
        %c0_22 = arith.constant 0 : index
        %39 = vector.load %arg11[%c0_21, %c0_22] : memref<1x128xf32, #tpu.memory_space<vmem>>, vector<1x128xf32>
        %cst_23 = arith.constant 1.250000e-01 : f32
        %40 = vector.broadcast %cst_23 : f32 to vector<1x128xf32>
        %41 = arith.mulf %39, %40 : vector<1x128xf32>
        %42 = arith.mulf %38, %38 : vector<1x128xf32>
        %43 = arith.subf %41, %42 : vector<1x128xf32>
        %cst_24 = arith.constant 0.000000e+00 : f32
        %44 = vector.broadcast %cst_24 : f32 to vector<1x128xf32>
        %45 = arith.maximumf %43, %44 : vector<1x128xf32>
        %cst_25 = arith.constant 9.99999974E-6 : f32
        %46 = vector.broadcast %cst_25 : f32 to vector<1x128xf32>
        %47 = arith.addf %45, %46 : vector<1x128xf32>
        %48 = math.rsqrt %47 : vector<1x128xf32>
        %c0_26 = arith.constant 0 : index
        %c0_27 = arith.constant 0 : index
        %49 = vector.load %arg4[%c0_26, %c0_27] : memref<1x128xf32, #tpu.memory_space<vmem>>, vector<1x128xf32>
        %50 = arith.mulf %48, %49 : vector<1x128xf32>
        %c0_28 = arith.constant 0 : index
        %c0_29 = arith.constant 0 : index
        %51 = vector.load %arg12[%c0_28, %c0_29] : memref<1x128xf32, #tpu.memory_space<vmem>>, vector<1x128xf32>
        tpu.vector_store %arg12[%c0_28, %c0_29], %50 {strides = array<i32>} : memref<1x128xf32, #tpu.memory_space<vmem>>, vector<1x128xf32>,
        %c0_30 = arith.constant 0 : index
        %c0_31 = arith.constant 0 : index
        %52 = vector.load %arg5[%c0_30, %c0_31] : memref<1x128xf32, #tpu.memory_space<vmem>>, vector<1x128xf32>
        %53 = arith.mulf %38, %50 : vector<1x128xf32>
        %54 = arith.subf %52, %53 : vector<1x128xf32>
        %c0_32 = arith.constant 0 : index
        %c0_33 = arith.constant 0 : index
        %55 = vector.load %arg13[%c0_32, %c0_33] : memref<1x128xf32, #tpu.memory_space<vmem>>, vector<1x128xf32>
        tpu.vector_store %arg13[%c0_32, %c0_33], %54 {strides = array<i32>} : memref<1x128xf32, #tpu.memory_space<vmem>>, vector<1x128xf32>,
      } else {
      }
      %9 = arith.index_cast %arg1 : i32 to index
      %c0 = arith.constant 0 : index
      %c0_4 = arith.constant 0 : index
      %10 = vector.load %arg9[%9, %c0, %c0_4] : memref<1x8x128xf32, #tpu.memory_space<vmem>>, vector<1x8x128xf32>
      %11 = vector.shape_cast %10 : vector<1x8x128xf32> to vector<8x128xf32>
      %c0_5 = arith.constant 0 : index
      %c0_6 = arith.constant 0 : index
      %12 = vector.load %arg12[%c0_5, %c0_6] : memref<1x128xf32, #tpu.memory_space<vmem>>, vector<1x128xf32>
      %13 = vector.broadcast %12 : vector<1x128xf32> to vector<8x128xf32>
      %14 = arith.mulf %11, %13 : vector<8x128xf32>
      %c0_7 = arith.constant 0 : index
      %c0_8 = arith.constant 0 : index
      %15 = vector.load %arg13[%c0_7, %c0_8] : memref<1x128xf32, #tpu.memory_space<vmem>>, vector<1x128xf32>
      %16 = vector.broadcast %15 : vector<1x128xf32> to vector<8x128xf32>
      %17 = arith.addf %14, %16 : vector<8x128xf32>
      %cst = arith.constant 0.000000e+00 : f32
      %18 = vector.broadcast %cst : f32 to vector<8x128xf32>
      %19 = arith.maximumf %17, %18 : vector<8x128xf32>
      %c0_9 = arith.constant 0 : index
      %c0_10 = arith.constant 0 : index
      %20 = vector.load %arg6[%c0_9, %c0_10] : memref<128x128xf32, #tpu.memory_space<vmem>>, vector<128x128xf32>
      %cst_11 = arith.constant dense<0.000000e+00> : vector<8x128xf32>
      %21 = tpu.matmul %19, %20, %cst_11 {dimension_numbers = #tpu.dot_dimension_numbers<[1], [0], [0], [1], [0, 0, 1, 1], [], []>} : vector<8x128xf32>, vector<128x128xf32>, vector<8x128xf32> -> vector<8x128xf32>
      %c0_12 = arith.constant 0 : index
      %c0_13 = arith.constant 0 : index
      %22 = vector.load %arg7[%c0_12, %c0_13] : memref<1x128xf32, #tpu.memory_space<vmem>>, vector<1x128xf32>
      %23 = vector.broadcast %22 : vector<1x128xf32> to vector<8x128xf32>
      %24 = arith.addf %21, %23 : vector<8x128xf32>
      %cst_14 = arith.constant dense<0xFF800000> : vector<8xf32>
      %25 = vector.multi_reduction <maximumf>, %24, %cst_14 [1] : vector<8x128xf32> to vector<8xf32>
      %26 = vector.shape_cast %25 : vector<8xf32> to vector<8x1xf32>
      %27 = vector.broadcast %26 : vector<8x1xf32> to vector<8x128xf32>
      %28 = arith.subf %24, %27 : vector<8x128xf32>
      %29 = math.exp %28 : vector<8x128xf32>
      %cst_15 = arith.constant dense<0.000000e+00> : vector<8xf32>
      %30 = vector.multi_reduction <add>, %29, %cst_15 [1] : vector<8x128xf32> to vector<8xf32>
      %31 = vector.shape_cast %30 : vector<8xf32> to vector<8x1xf32>
      %32 = tpu.reciprocal %31 {approx = true} : vector<8x1xf32> -> vector<8x1xf32>
      %33 = vector.broadcast %32 : vector<8x1xf32> to vector<8x128xf32>
      %34 = arith.mulf %29, %33 : vector<8x128xf32>
      %c0_16 = arith.constant 0 : index
      %c0_17 = arith.constant 0 : index
      %35 = vector.load %arg8[%c0_16, %c0_17] : memref<8x128xf32, #tpu.memory_space<vmem>>, vector<8x128xf32>
      tpu.vector_store %arg8[%c0_16, %c0_17], %34 {strides = array<i32>} : memref<8x128xf32, #tpu.memory_space<vmem>>, vector<8x128xf32>,
    } else {
    }
    return
  }
  func.func @transform_0(%arg0: i32, %arg1: i32) -> (i32, i32) {
    %c1_i32 = arith.constant 1 : i32
    %0 = arith.subi %c1_i32, %arg0 : i32
    %1 = arith.muli %0, %arg1 : i32
    %c0_i32 = arith.constant 0 : i32
    %c0_i32_0 = arith.constant 0 : i32
    return %1, %c0_i32 : i32, i32
  }
  func.func @transform_1(%arg0: i32, %arg1: i32) -> (i32, i32) {
    %c0_i32 = arith.constant 0 : i32
    %c0_i32_0 = arith.constant 0 : i32
    %c0_i32_1 = arith.constant 0 : i32
    return %c0_i32, %c0_i32_0 : i32, i32
  }
  func.func @transform_2(%arg0: i32, %arg1: i32) -> (i32, i32) {
    %c0_i32 = arith.constant 0 : i32
    %c0_i32_0 = arith.constant 0 : i32
    %c0_i32_1 = arith.constant 0 : i32
    return %c0_i32, %c0_i32_0 : i32, i32
  }
  func.func @transform_3(%arg0: i32, %arg1: i32) -> (i32, i32) {
    %c0_i32 = arith.constant 0 : i32
    %c0_i32_0 = arith.constant 0 : i32
    %c0_i32_1 = arith.constant 0 : i32
    return %c0_i32, %c0_i32_0 : i32, i32
  }
  func.func @transform_4(%arg0: i32, %arg1: i32) -> (i32, i32) {
    %c0_i32 = arith.constant 0 : i32
    %c0_i32_0 = arith.constant 0 : i32
    %c0_i32_1 = arith.constant 0 : i32
    return %c0_i32, %c0_i32_0 : i32, i32
  }
  func.func @transform_5(%arg0: i32, %arg1: i32) -> (i32, i32) {
    %c0_i32 = arith.constant 0 : i32
    %c0_i32_0 = arith.constant 0 : i32
    %c0_i32_1 = arith.constant 0 : i32
    return %c0_i32, %c0_i32_0 : i32, i32
  }
  func.func @transform_6(%arg0: i32, %arg1: i32) -> (i32, i32) {
    %0 = arith.muli %arg0, %arg1 : i32
    %c0_i32 = arith.constant 0 : i32
    %c0_i32_0 = arith.constant 0 : i32
    return %0, %c0_i32 : i32, i32
  }
}

</mosaic_0001>

<bundles_post_ra>
// kernel: tpu_custom_call.1
= control target key start
LH: loop header
LB: loop body
LE: loop exit
PB: predicated region body
PF: predicated region fallthrough
CT: control target
= control target key end

     0   :  { %11 = vsyncpa [#allocation8], 0  ;;  %s987_s0 = inlined_call_operand.hbm [shape: f32[8,64], index: 0, kind: input, shape index: {}]   ;;  %s988_s1 = inlined_call_operand.hbm [shape: f32[64,128], index: 1, kind: input, shape index: {}]   ;;  %s989_s2 = inlined_call_operand.vmem [shape: f32[1,128], index: 2, kind: input, shape index: {}]   ;;  %s990_s3 = inlined_call_operand.vmem [shape: f32[1,128], index: 3, kind: input, shape index: {}]   ;;  %s991_s4 = inlined_call_operand.hbm [shape: f32[128,128], index: 4, kind: input, shape index: {}]   ;;  %s992_s5 = inlined_call_operand.vmem [shape: f32[1,128], index: 5, kind: input, shape index: {}]   ;;  %s993_s6 = inlined_call_operand.hbm [shape: f32[8,128], index: 6, kind: output, shape index: {}]  }
   0x1   :  { %13 = vsyncpa [#allocation8 + $0x1], 0 }
   0x2   :  { %14 = vsyncpa [#allocation11], 0 }
   0x3   :  { %15 = vsyncpa [#allocation9], 0 }
   0x4   :  { %17 = vsyncpa [#allocation9 + $0x1], 0  ;;  %s900_s21 = smov 0   ;;  %s902_s22 = smov 0  }
   0x5   :  { %s904_s23 = smov 0  }
   0x6 LB: > { %s605_s24 = sadd.s32 4294967295, %s856_s23   ;;  %s606_s25 = sadd.s32 4294967294, %s856_s23   ;;  %s856_s23 = sphi %s904_s23, %s23_s23   ;;  %s852_s22 = sphi %s902_s22, %s997_s22   ;;  %s848_s21 = sphi %s900_s21, %s996_s21  }
   0x7   : > { %s35_s26 = sadd.s32 1, %s852_s22  ;;  %p607_p0 = scmp.ge.s32.totalorder %s856_s23, 1 }
   0x8   : > { %p37_p1 = scmp.ge.s32.totalorder %s35_s26, 2  ;;  %p203_p2 = scmp.lt.s32.totalorder %s856_s23, 3 }
   0x9   : > { %p922_p3 = scmp.eq.s32.totalorder %s605_s24, 0  ;;  %s214_s7 = sshll.u32 %s988_s1, 4  ;;  %s215_s7 = int_to_ptr.hbm [resolvable:$true] %s214_s7 }
   0xa   : > { %s999_s26 = smov (%p37_p1, %s35_s26), 0  ;;  %p928_p4 = pnand %p607_p0, %p203_p2 }
   0xb   : > { %s858_s8 = smov [#allocation10]   ;;  %p610_p7 = scmp.ge.s32.totalorder %s856_s23, 2 }
   0xc   : > { %p639_p5 = pneg %p928_p4  ;;  %s216_s9 = sshll.u32 %s858_s8, 4  ;;  %s217_s9 = int_to_ptr.vmem [resolvable:$true] %s216_s9 }
   0xd   : > { %s234_s12 = sshll.u32 %s991_s4, 4  ;;  %s859_s13 = smov 128   ;;  %s235_s12 = int_to_ptr.hbm [resolvable:$true] %s234_s12 }
   0xe   : > { %p640_p6 = pnand %p922_p3, %p639_p5  ;;  %s860_s14 = smov 8  }
   0xf   : > { %s861_s15 = smov [#allocation12]   ;;  %p656_p8 = scmp.lt.s32.totalorder %s856_s23, 2 }
  0x10   : > { %642 = dma.hbm_to_vmem [thread:$0]  (!%p640_p6), %s215_s7, 1024, %s217_s9, [#allocation11], %s859_s13, %s859_s13, %s860_s14  }
  0x11   : > { %s236_s16 = sshll.u32 %s861_s15, 4  ;;  %p657_p9 = scmp.eq.s32.totalorder %s856_s23, 0  ;;  %s237_s16 = int_to_ptr.vmem [resolvable:$true] %s236_s16 }
  0x12   : > { %645 = dma.hbm_to_vmem [thread:$0]  (!%p640_p6), %s235_s12, 2048, %s237_s16, [#allocation11], %s859_s13, %s859_s13, %s860_s14  }
  0x13   : > { %s265_s19 = sshll.u32 %s987_s0, 4  ;;  %s862_s20 = smov [#allocation7]   ;;  %s266_s19 = int_to_ptr.hbm [resolvable:$true] %s265_s19 }
  0x14   : > { %s267_s29 = sshll.u32 %s862_s20, 4  ;;  %p647_p10 = pnand %p657_p9, %p656_p8  ;;  %s268_s29 = int_to_ptr.vmem [resolvable:$true] %s267_s29 }
  0x15   : > { %276 = sbr.rel (%p928_p4) target bundleno = 635 (0x27b), region = 44 }
  0x16   : > { %649 = dma.hbm_to_vmem [thread:$0]  (!%p647_p10), %s266_s19, 128, %s268_s29, [#allocation8]  }
  0x1a   : > { %835 = dma.done.wait (%p922_p3), [#allocation8], 128  }
  0x1b   : > { %837 = vsyncadd (%p922_p3), [#allocation8], 4294967168 }
  0x1c   : > { %839 = dma.done.wait (%p922_p3), [#allocation11], 3072  }
  0x1d   : > { %841 = vsyncadd (%p922_p3), [#allocation11], 4294964224  ;;  %p616_p11 = scmp.ne.s32.totalorder %s848_s21, 0 }
  0x1f   : > { %328 = sbr.rel (%p616_p11) target bundleno = 195 (0xc3), region = 60 }
  0x24   : > { %v343_v0 = vld [vmem:[#allocation10 + $0x38] sm:$0xff]  ;;  %v342_v1 = vld [vmem:[#allocation10 + $0x30] sm:$0xff]  ;;  %v863_v2 = vmov 0.0   ;;  %v341_v3 = vld [vmem:[#allocation10 + $0x28] sm:$0xff]  ;;  %vm344_vm0 = vcmask 523264  }
  0x25   : > { %356 = vmatpush.msra.mxu0 %v343_v0  ;;  %333 = vst [vmem:[#allocation3] sm:$0x1] %v863_v2  ;;  %v340_v4 = vld [vmem:[#allocation10 + $0x20] sm:$0xff]  ;;  %v339_v5 = vld [vmem:[#allocation10 + $0x18] sm:$0xff]  ;;  %v338_v6 = vld [vmem:[#allocation10 + $0x10] sm:$0xff] }
  0x26   : > { %334 = vst [vmem:[#allocation4] sm:$0x1] %v863_v2  ;;  %v337_v7 = vld [vmem:[#allocation10 + $0x8] sm:$0xff]  ;;  %v336_v8 = vld [vmem:[#allocation10] sm:$0xff]  ;;  %v335_v9 = vld [vmem:[#allocation7] sm:$0xff] }
  0x27   : > { %357 = vmatpush.msra.mxu0 %v342_v1 }
  0x29   : > { %358 = vmatpush.msra.mxu0 %v341_v3 }
  0x2b   : > { %359 = vmatpush.msra.mxu0 %v340_v4 }
  0x2c   : > { %v371_v21 = vld [vmem:[#allocation3] sm:$0x1] }
  0x2d   : > { %360 = vmatpush.msra.mxu0 %v339_v5  ;;  %v380_v24 = vld [vmem:[#allocation4] sm:$0x1] }
  0x2f   : > { %361 = vmatpush.msra.mxu0 %v338_v6 }
  0x31   : > { %362 = vmatpush.msra.mxu0 %v337_v7 }
  0x33   : > { %363 = vmatpush.msra.mxu0 %v336_v8 }
  0x34   : > { %617 = vmatmul.msk.f32.vlgmr.msra.gmra.mxu0 %vm344_vm0, %v335_v9 }
  0xb1   : > { %v365_v10 = vpop.f32.mrf.mxu0 }
  0xb2   : > { %370 = vst [vmem:[#allocation2] sm:$0xff] %v365_v10  ;;  %v372_v11 = vrot.slane %v365_v10, 4  ;;  %v381_v12 = vmul.f32 %v365_v10, %v365_v10 }
  0xb4   : > { %v373_v13 = vadd.f32 %v372_v11, %v365_v10  ;;  %v382_v14 = vrot.slane %v381_v12, 4 }
  0xb6   : > { %v374_v15 = vrot.slane %v373_v13, 2  ;;  %v383_v16 = vadd.f32 %v382_v14, %v381_v12 }
  0xb8   : > { %v375_v17 = vadd.f32 %v374_v15, %v373_v13  ;;  %v384_v18 = vrot.slane %v383_v16, 2 }
  0xba   : > { %v376_v19 = vrot.slane %v375_v17, 1  ;;  %v385_v20 = vadd.f32 %v384_v18, %v383_v16 }
  0xbc   : > { %v377_v22 = vadd.f32 %v376_v19, %v375_v17  ;;  %v386_v23 = vrot.slane %v385_v20, 1 }
  0xbe   : > { %v378_v25 = vadd.f32 %v377_v22, %v371_v21  ;;  %v387_v26 = vadd.f32 %v386_v23, %v385_v20 }
  0xc0   : > { %379 = vst [vmem:[#allocation3] sm:$0x1] %v378_v25  ;;  %v388_v27 = vadd.f32 %v387_v26, %v380_v24 }
  0xc2   : > { %389 = vst [vmem:[#allocation4] sm:$0x1] %v388_v27 }
  0xc3 PF: > { %p618_p12 = scmp.ne.s32.totalorder %s848_s21, 1 }
  0xc5   : > { %393 = sbr.rel (%p618_p12) target bundleno = 631 (0x277), region = 68 }
  0xca   : > { %v452_v28 = vld [vmem:[#allocation12 + $0x78] sm:$0xff]  ;;  %v451_v29 = vld [vmem:[#allocation12 + $0x70] sm:$0xff]  ;;  %v450_v30 = vld [vmem:[#allocation12 + $0x68] sm:$0xff] }
  0xcb   : > { %457 = vmatpush.msra.mxu0 %v452_v28  ;;  %v449_v31 = vld [vmem:[#allocation12 + $0x60] sm:$0xff]  ;;  %v398_v32 = vld [vmem:[#allocation3] sm:$0x1]  ;;  %v400_v33 = vld [vmem:[#allocation4] sm:$0x1] }
  0xcc   : > { %v448_v34 = vld [vmem:[#allocation12 + $0x58] sm:$0xff]  ;;  %v399_v35 = vmul.f32 0.125, %v398_v32  ;;  %v401_v36 = vmul.f32 0.125, %v400_v33  ;;  %v447_v37 = vld [vmem:[#allocation12 + $0x50] sm:$0xff]  ;;  %v446_v39 = vld [vmem:[#allocation12 + $0x48] sm:$0xff] }
  0xcd   : > { %458 = vmatpush.msra.mxu0 %v451_v29  ;;  %v445_v41 = vld [vmem:[#allocation12 + $0x40] sm:$0xff]  ;;  %v444_v43 = vld [vmem:[#allocation12 + $0x38] sm:$0xff]  ;;  %v443_v45 = vld [vmem:[#allocation12 + $0x30] sm:$0xff] }
  0xce   : > { %v402_v38 = vmul.f32 %v399_v35, %v399_v35  ;;  %v442_v46 = vld [vmem:[#allocation12 + $0x28] sm:$0xff]  ;;  %v441_v47 = vld [vmem:[#allocation12 + $0x20] sm:$0xff]  ;;  %v440_v49 = vld [vmem:[#allocation12 + $0x18] sm:$0xff] }
  0xcf   : > { %459 = vmatpush.msra.mxu0 %v450_v30  ;;  %v439_v51 = vld [vmem:[#allocation12 + $0x10] sm:$0xff]  ;;  %v438_v53 = vld [vmem:[#allocation12 + $0x8] sm:$0xff]  ;;  %v437_v55 = vld [vmem:[#allocation12] sm:$0xff] }
  0xd0   : > { %v403_v40 = vsub.f32 %v401_v36, %v402_v38  ;;  %v416_v58 = vld [vmem:[%s989_s2] sm:$0x1] }
  0xd1   : > { %460 = vmatpush.msra.mxu0 %v449_v31  ;;  %v419_v61 = vld [vmem:[%s990_s3] sm:$0x1] }
  0xd2   : > { %v404_v42 = vmax.f32 %v403_v40, 0.0  ;;  %v425_v0 = vld [vmem:[#allocation2] sm:$0xff] }
  0xd3   : > { %461 = vmatpush.msra.mxu0 %v448_v34  ;;  %v697_v6 = vld [vmem:[%s992_s5] ss:$0 sm:$0xff] }
  0xd4   : > { %v405_v44 = vadd.f32 1e-05, %v404_v42 }
  0xd5   : > { %462 = vmatpush.msra.mxu0 %v447_v37 }
  0xd6   : > { %698 = vrsqrt.f32 %v405_v44  ;;  %vm412_vm1 = vweird.f32 %v405_v44 }
  0xd7   : > { %463 = vmatpush.msra.mxu0 %v446_v39 }
  0xd9   : > { %464 = vmatpush.msra.mxu0 %v445_v41 }
  0xdb   : > { %465 = vmatpush.msra.mxu0 %v444_v43 }
  0xdc   : > { %v699_v48 = vpop.eup %698 }
  0xdd   : > { %466 = vmatpush.msra.mxu0 %v443_v45  ;;  %v407_v50 = vmul.f32 %v699_v48, %v405_v44  ;;  %vm413_vm2 = vweird.f32 %v699_v48 }
  0xde   : > { %vm414_vm3 = vmor %vm412_vm1, %vm413_vm2 }
  0xdf   : > { %467 = vmatpush.msra.mxu0 %v442_v46  ;;  %v408_v52 = vmul.f32 %v699_v48, %v407_v50 }
  0xe1   : > { %468 = vmatpush.msra.mxu0 %v441_v47  ;;  %v409_v54 = vmul.f32 0.5, %v408_v52 }
  0xe3   : > { %469 = vmatpush.msra.mxu0 %v440_v49  ;;  %v410_v56 = vsub.f32 1.5, %v409_v54 }
  0xe5   : > { %470 = vmatpush.msra.mxu0 %v439_v51  ;;  %v411_v57 = vmul.f32 %v699_v48, %v410_v56 }
  0xe7   : > { %471 = vmatpush.msra.mxu0 %v438_v53  ;;  %v415_v59 = vsel %vm414_vm3, %v699_v48, %v411_v57 }
  0xe8   : > { %v417_v60 = vmul.f32 %v416_v58, %v415_v59 }
  0xe9   : > { %472 = vmatpush.msra.mxu0 %v437_v55 }
  0xea   : > { %418 = vst [vmem:[#allocation5] sm:$0x1] %v417_v60  ;;  %v420_v62 = vmul.f32 %v417_v60, %v399_v35 }
  0xec   : > { %v421_v63 = vsub.f32 %v419_v61, %v420_v62 }
  0xee   : > { %422 = vst [vmem:[#allocation6] sm:$0x1] %v421_v63 }
  0xf1   : > { %v695_v1 = vld [vmem:[#allocation5] ss:$0 sm:$0xff] }
  0xf2   : > { %v430_v2 = vmul.f32 %v695_v1, %v425_v0 }
  0xf5   : > { %v696_v3 = vld [vmem:[#allocation6] ss:$0 sm:$0xff] }
  0xf6   : > { %v435_v4 = vadd.f32 %v696_v3, %v430_v2 }
  0xf8   : > { %v436_v5 = vmax.f32 %v435_v4, 0.0 }
  0xfa   : > { %473 = vmatmul.f32.vlgmr.msra.gmra.mxu0 %v436_v5 }
 0x177   : > { %v474_v7 = vpop.f32.mrf.mxu0 }
 0x178   : > { %v475_v8 = vadd.f32 %v697_v6, %v474_v7 }
 0x17a   : > { %477 = vmax.xlane.f32.xlu0 %v475_v8 }
 0x1ed   : > { %v478_v9 = vpop.xlane.xlu0 %477 }
 0x1ee   : > { %v479_v10 = vsub.f32 %v475_v8, %v478_v9 }
 0x1f0   : > { %v480_v11 = vmul.f32 1.442695, %v479_v10 }
 0x1f2   : > { %700 = vpow2.f32 %v480_v11 }
 0x1f8   : > { %v701_v12 = vpop.eup %700 }
 0x1f9   : > { %482 = vadd.xlane.f32.xlu0 %v701_v12 }
 0x26c   : > { %v483_v13 = vpop.xlane.xlu0 %482 }
 0x26d   : > { %702 = vrcp.f32 %v483_v13 }
 0x273   : > { %v703_v14 = vpop.eup %702 }
 0x274   : > { %v485_v15 = vmul.f32 %v703_v14, %v701_v12 }
 0x276   : > { %486 = vst [vmem:[#allocation13] sm:$0xff] %v485_v15 }
 0x277 PF: > { %p661_p13 = scmp.eq.s32.totalorder %s605_s24, 1  ;;  %s503_s11 = sshll.u32 %s993_s6, 4  ;;  %s504_s11 = int_to_ptr.hbm [resolvable:$true] %s503_s11 }
 0x278   : > { %s864_s12 = smov [#allocation13]  }
 0x279   : > { %s501_s13 = sshll.u32 %s864_s12, 4  ;;  %s502_s13 = int_to_ptr.vmem [resolvable:$true] %s501_s13 }
 0x27a   : > { %636 = dma.vmem_to_hbm [thread:$0]  (%p661_p13), %s502_s13, 128, %s504_s11, [#allocation9]  }
 0x27b PF: > { %p663_p0 = scmp.eq.s32.totalorder %s606_s25, 1 }
 0x27d   : > { %p651_p1 = pnand %p663_p0, %p610_p7 }
 0x27f   : > { %p652_p2 = pneg %p651_p1 }
 0x281   : > { %843 = dma.done.wait (%p652_p2), [#allocation9], 128  }
 0x282   : > { %845 = vsyncadd (%p652_p2), [#allocation9], 4294967168  ;;  %s23_s23 = sadd.s32 1, %s856_s23   ;;  %s996_s21 = smov %s852_s22 }
 0x283   : > { %p20_p3 = scmp.ge.s32.totalorder %s23_s23, 4   ;;  %s997_s22 = smov %s999_s26 }
 0x285   :  { %22 = sbr.rel (!%p20_p3) target bundleno = 6 (0x6), region = 115 }
 0x28a   :  { %522 = vsyncpa [#allocation8], 1 }
 0x28b   :  { %524 = vsyncpa [#allocation8 + $0x1], 1 }
 0x28c   :  { %525 = vsyncpa [#allocation11], 1 }
 0x28d   :  { %526 = vsyncpa [#allocation9], 1 }
 0x28e   :  { %528 = vsyncpa [#allocation9 + $0x1], 1 }

</bundles_post_ra>
